<compile_context>
chip_gen: v5e
topology: v5e:2x2
jax: 0.10.0
libtpu: 0.0.40
codegen_flags: <defaults>
</compile_context>

<pallas_src>
import functools

import jax
import jax.numpy as jnp
from jax import lax
from jax.experimental import pallas as pl
from jax.experimental.pallas import tpu as pltpu


def _round_up(x, m):
    return (x + m - 1) // m * m


def _vmem_capacity_bytes():
    """Per-TensorCore VMEM capacity (v5e/v6e: 128 MiB, v7x: 64 MiB per TC).

    Each TensorCore holds its own copy of resident blocks, so all budgeting is per-core.
    """
    try:
        return int(pltpu.get_tpu_info().vmem_capacity_bytes)
    except Exception:
        return 64 * 1024 * 1024  # conservative per-core default (v7x)


# ----------------------------- kernels -------------------------------------

def _gather_onehot_kernel(idx_ref, w_ref, out_ref):
    """Gather rows with a one-hot matmul: the (otherwise idle) MXU does the row moves.

    idx_ref : VMEM (TB, 1) int32   per-block token ids
    w_ref   : VMEM (V, D)          resident embedding table (constant block index)
    out_ref : VMEM (TB, D)         dense per-step output tile
    """
    tb = out_ref.shape[0]
    v = w_ref.shape[0]
    idx = idx_ref[...]                                       # (TB, 1)
    iota = lax.broadcasted_iota(jnp.int32, (tb, v), 1)       # (TB, V)
    onehot = (iota == idx).astype(w_ref.dtype)               # exactly 0.0 / 1.0
    # HIGHEST precision -> exact row selection for f32 tables (multi-pass MXU).
    out_ref[...] = jnp.dot(
        onehot, w_ref[...],
        precision=lax.Precision.HIGHEST,
        preferred_element_type=jnp.float32,
    ).astype(out_ref.dtype)


def _gather_rows_kernel(idx_ref, w_ref, out_ref, *, token_block):
    """Row-by-row fallback for large vocabularies (one-hot matmul too expensive).

    idx_ref : SMEM (TB,) int32 (per-block tile, pipelined)
    TODO(synk): replace with HBM-resident per-row make_async_copy gather for huge tables.
    """
    def body(t, carry):
        idx = idx_ref[t]
        out_ref[pl.ds(t, 1), :] = w_ref[pl.ds(idx, 1), :]
        return carry

    lax.fori_loop(0, token_block, body, 0, unroll=8)


# ----------------------------- wrapper --------------------------------------

def pallas_embedding(indices, weight, *, mode="none", weight_bits=8,
                     step=0, start_step=0, onehot_max_vocab=2048):
    """Forward pass of quantEmbedding.Embedding as a Pallas TPU kernel."""
    assert mode in ("none", "manmp"), "mode='automp' calls sys.exit() in the reference"
    V, D = weight.shape
    dtype = weight.dtype
    itemsize = jnp.dtype(dtype).itemsize

    # --- fake-quantize the table once (per-tensor scale => quant-then-gather is
    #     mathematically identical to gather-then-quant, and costs V*D once instead of
    #     N*D per call).  Done as a fused XLA op in the wrapper (review-sanctioned);
    #     the Pallas kernels below only gather. ---
    if mode == "manmp" and step >= start_step:
        qmax = float(2 ** (weight_bits - 1) - 1)
        qmin = -float(2 ** (weight_bits - 1))
        wf = weight.astype(jnp.float32)
        scale = jnp.max(jnp.abs(wf)) / qmax
        # Guard the degenerate all-zero table (reference divides by zero -> NaN).
        scale = jnp.maximum(scale, jnp.float32(1e-30))
        weight = (jnp.clip(jnp.round(wf / scale), qmin, qmax) * scale).astype(dtype)

    # Clamp indices defensively: OOB indices on a VMEM ref are silently wrong on TPU.
    # (PyTorch would raise an index error instead.)
    flat_idx = jnp.clip(indices.reshape(-1).astype(jnp.int32), 0, V - 1)
    N = int(flat_idx.shape[0])

    vmem_cap = _vmem_capacity_bytes()
    usable = int(vmem_cap * 0.85)
    table_bytes = V * D * itemsize
    use_onehot = V <= onehot_max_vocab

    def build_and_call(table_buffers):
        table_footprint = table_buffers * table_bytes
        budget = usable - table_footprint - (2 << 20)
        if budget <= 0:
            # TODO(synk): HBM-resident manual-DMA row-gather path for huge tables.
            raise ValueError(
                "embedding table too large for the VMEM-resident gather path "
                f"({table_bytes / 2**20:.1f} MiB, per-core VMEM {vmem_cap / 2**20:.1f} MiB)")

        # Adaptive token block: largest multiple of 8 (capped at 1024) whose per-step
        # footprint fits the VMEM left after the resident table.
        #   * double-buffered (TB, D) output tile
        #   * double-buffered (TB, 1) i32 index column (lane-padded to 128 -> 512 B/token)
        #   * one-hot path: (TB, V) one-hot + iota intermediates
        per_token = 2 * D * itemsize + 2 * 512
        if use_onehot:
            per_token += V * (itemsize + 4)
        tb = min(1024, max(8, budget // per_token), _round_up(N, 8))
        tb = max(8, (tb // 8) * 8)

        n_pad = _round_up(N, tb)
        idx = flat_idx
        if n_pad != N:
            idx = jnp.pad(idx, (0, n_pad - N))   # pad with valid row 0; sliced off below
        n_blocks = n_pad // tb

        vmem_limit = int(min(vmem_cap,
                             max(table_footprint + tb * per_token + (4 << 20), 32 << 20)))

        w_kwargs = {}
        if table_buffers == 1:
            # Constant index_map -> the table is fetched once; double-buffering it buys
            # nothing and would double its VMEM footprint.
            w_kwargs["pipeline_mode"] = pl.Buffered(1)
        w_spec = pl.BlockSpec((V, D), lambda i: (0, 0), **w_kwargs)
        out_spec = pl.BlockSpec((tb, D), lambda i: (i, 0))
        cparams = pltpu.CompilerParams(
            dimension_semantics=("parallel",),   # disjoint output tiles -> megacore OK
            vmem_limit_bytes=vmem_limit)

        if use_onehot:
            idx2d = idx.reshape(n_pad, 1)
            idx_spec = pl.BlockSpec((tb, 1), lambda i: (i, 0))
            kernel = _gather_onehot_kernel
            operands = (idx2d, weight)
        else:
            idx_spec = pl.BlockSpec((tb,), lambda i: (i,),
                                    memory_space=pltpu.MemorySpace.SMEM)
            kernel = functools.partial(_gather_rows_kernel, token_block=tb)
            operands = (idx, weight)

        return pl.pallas_call(
            kernel,
            out_shape=jax.ShapeDtypeStruct((n_pad, D), dtype),
            grid=(n_blocks,),
            in_specs=[idx_spec, w_spec],
            out_specs=out_spec,
            compiler_params=cparams,
        )(*operands)

    try:
        # Preferred: single-buffered resident table (halves its VMEM footprint).
        out_flat = build_and_call(table_buffers=1)
    except Exception:
        # Fallback: default double-buffering with a correspondingly conservative budget.
        out_flat = build_and_call(table_buffers=2)

    return out_flat[:N].reshape(indices.shape + (D,))


# ----------------------------- reference ------------------------------------

def _ref_fake_quant(w, num_bits):
    qmax = float(2 ** (num_bits - 1) - 1)
    qmin = -float(2 ** (num_bits - 1))
    s = jnp.max(jnp.abs(w)) / qmax
    return jnp.clip(jnp.round(w / s), qmin, qmax) * s


def _ref_embedding(indices, weight, *, mode, weight_bits, step, start_step):
    if mode == "manmp" and step >= start_step:
        weight = _ref_fake_quant(weight, weight_bits)
    return weight[indices]


# ----------------------------- main ------------------------------------------

if __name__ == "__main__":
    key = jax.random.PRNGKey(0)
    k_w, k_i, k_i2 = jax.random.split(key, 3)

    num_embeddings = 64
    embedding_dim = 128
    batch, seq = 2, 8
    padding_idx = 0
    weight_bits = 8

    # Embedding.initParameters: normal_() on the table, padding row zeroed.
    weight = jax.random.normal(k_w, (num_embeddings, embedding_dim), jnp.float32)
    weight = weight.at[padding_idx].set(0.0)

    indices = jax.random.randint(k_i, (batch, seq), 0, num_embeddings, jnp.int32)

    # --- mode='manmp', step >= startStep  (fake-quantized gather) ---
    out_q = pallas_embedding(indices, weight, mode="manmp",
                             weight_bits=weight_bits, step=1, start_step=0)
    out_q = jax.block_until_ready(out_q)
    ref_q = _ref_embedding(indices, weight, mode="manmp",
                           weight_bits=weight_bits, step=1, start_step=0)
    assert out_q.shape == (batch, seq, embedding_dim)
    assert jnp.allclose(out_q, ref_q, atol=1e-5, rtol=1e-5)

    # --- mode='none'  (plain gather) ---
    out_p = pallas_embedding(indices, weight, mode="none")
    out_p = jax.block_until_ready(out_p)
    ref_p = _ref_embedding(indices, weight, mode="none",
                           weight_bits=weight_bits, step=0, start_step=0)
    assert jnp.allclose(out_p, ref_p, atol=1e-5, rtol=1e-5)

    # --- mode='manmp' but step < startStep  (still plain gather) ---
    out_s = pallas_embedding(indices, weight, mode="manmp",
                             weight_bits=weight_bits, step=0, start_step=5)
    out_s = jax.block_until_ready(out_s)
    assert jnp.allclose(out_s, ref_p, atol=1e-5, rtol=1e-5)

    # --- non-multiple-of-8 token count (exercises the padding path) ---
    indices2 = jax.random.randint(k_i2, (3, 5), 0, num_embeddings, jnp.int32)
    out_r = pallas_embedding(indices2, weight, mode="manmp",
                             weight_bits=weight_bits, step=1, start_step=0)
    out_r = jax.block_until_ready(out_r)
    ref_r = _ref_embedding(indices2, weight, mode="manmp",
                           weight_bits=weight_bits, step=1, start_step=0)
    assert out_r.shape == (3, 5, embedding_dim)
    assert jnp.allclose(out_r, ref_r, atol=1e-5, rtol=1e-5)

    print("KERNEL_OK")
</pallas_src>

<mosaic_0001>
module attributes {stable_mosaic.version = 11 : i64} {
  func.func @_gather_onehot_kernel(%arg0: i32, %arg1: memref<16x1xi32, #tpu.memory_space<vmem>>, %arg2: memref<64x128xf32, #tpu.memory_space<vmem>>, %arg3: memref<16x128xf32, #tpu.memory_space<vmem>>) attributes {dimension_semantics = [#tpu.dimension_semantics<parallel>], iteration_bounds = array<i64: 1>, scalar_prefetch = 0 : i64, scratch_operands = 0 : i64, tpu.core_type = #tpu.core_type<tc>, window_params = [{transform_indices = @transform_0, window_bounds = array<i64: 16, 1>}, {pipeline_mode = #tpu.pipeline_mode<synchronous>, transform_indices = @transform_1, window_bounds = array<i64: 64, 128>}, {transform_indices = @transform_2, window_bounds = array<i64: 16, 128>}]} {
    %c0 = arith.constant 0 : index
    %c0_0 = arith.constant 0 : index
    %0 = vector.load %arg1[%c0, %c0_0] : memref<16x1xi32, #tpu.memory_space<vmem>>, vector<16x1xi32>
    %1 = tpu.iota {dimensions = array<i32: 1>} : vector<16x64xi32>
    %2 = vector.broadcast %0 : vector<16x1xi32> to vector<16x64xi32>
    %3 = arith.cmpi eq, %1, %2 : vector<16x64xi32>
    %4 = arith.extui %3 : vector<16x64xi1> to vector<16x64xi32>
    %5 = arith.sitofp %4 : vector<16x64xi32> to vector<16x64xf32>
    %c0_1 = arith.constant 0 : index
    %c0_2 = arith.constant 0 : index
    %6 = vector.load %arg2[%c0_1, %c0_2] : memref<64x128xf32, #tpu.memory_space<vmem>>, vector<64x128xf32>
    %cst = arith.constant dense<0.000000e+00> : vector<16x128xf32>
    %7 = tpu.matmul %5, %6, %cst {dimension_numbers = #tpu.dot_dimension_numbers<[1], [0], [0], [1], [0, 0, 1, 1], [], []>, precision = #tpu.contract_precision<fp32>} : vector<16x64xf32>, vector<64x128xf32>, vector<16x128xf32> -> vector<16x128xf32>
    %c0_3 = arith.constant 0 : index
    %c0_4 = arith.constant 0 : index
    %8 = vector.load %arg3[%c0_3, %c0_4] : memref<16x128xf32, #tpu.memory_space<vmem>>, vector<16x128xf32>
    tpu.vector_store %arg3[%c0_3, %c0_4], %7 {strides = array<i32>} : memref<16x128xf32, #tpu.memory_space<vmem>>, vector<16x128xf32>,
    return
  }
  func.func @transform_0(%arg0: i32) -> (i32, i32) {
    %c0_i32 = arith.constant 0 : i32
    %c0_i32_0 = arith.constant 0 : i32
    return %arg0, %c0_i32 : i32, i32
  }
  func.func @transform_1(%arg0: i32) -> (i32, i32) {
    %c0_i32 = arith.constant 0 : i32
    %c0_i32_0 = arith.constant 0 : i32
    %c0_i32_1 = arith.constant 0 : i32
    return %c0_i32, %c0_i32_0 : i32, i32
  }
  func.func @transform_2(%arg0: i32) -> (i32, i32) {
    %c0_i32 = arith.constant 0 : i32
    %c0_i32_0 = arith.constant 0 : i32
    return %arg0, %c0_i32 : i32, i32
  }
}

module attributes {stable_mosaic.version = 11 : i64} {
  func.func @_gather_onehot_kernel(%arg0: i32, %arg1: memref<16x1xi32, #tpu.memory_space<vmem>>, %arg2: memref<64x128xf32, #tpu.memory_space<vmem>>, %arg3: memref<16x128xf32, #tpu.memory_space<vmem>>) attributes {dimension_semantics = [#tpu.dimension_semantics<parallel>], iteration_bounds = array<i64: 1>, scalar_prefetch = 0 : i64, scratch_operands = 0 : i64, tpu.core_type = #tpu.core_type<tc>, window_params = [{transform_indices = @transform_0, window_bounds = array<i64: 16, 1>}, {pipeline_mode = #tpu.pipeline_mode<synchronous>, transform_indices = @transform_1, window_bounds = array<i64: 64, 128>}, {transform_indices = @transform_2, window_bounds = array<i64: 16, 128>}]} {
    %c0 = arith.constant 0 : index
    %c0_0 = arith.constant 0 : index
    %0 = vector.load %arg1[%c0, %c0_0] : memref<16x1xi32, #tpu.memory_space<vmem>>, vector<16x1xi32>
    %1 = tpu.iota {dimensions = array<i32: 1>} : vector<16x64xi32>
    %2 = vector.broadcast %0 : vector<16x1xi32> to vector<16x64xi32>
    %3 = arith.cmpi eq, %1, %2 : vector<16x64xi32>
    %4 = arith.extui %3 : vector<16x64xi1> to vector<16x64xi32>
    %5 = arith.sitofp %4 : vector<16x64xi32> to vector<16x64xf32>
    %c0_1 = arith.constant 0 : index
    %c0_2 = arith.constant 0 : index
    %6 = vector.load %arg2[%c0_1, %c0_2] : memref<64x128xf32, #tpu.memory_space<vmem>>, vector<64x128xf32>
    %cst = arith.constant dense<0.000000e+00> : vector<16x128xf32>
    %7 = tpu.matmul %5, %6, %cst {dimension_numbers = #tpu.dot_dimension_numbers<[1], [0], [0], [1], [0, 0, 1, 1], [], []>, precision = #tpu.contract_precision<fp32>} : vector<16x64xf32>, vector<64x128xf32>, vector<16x128xf32> -> vector<16x128xf32>
    %c0_3 = arith.constant 0 : index
    %c0_4 = arith.constant 0 : index
    %8 = vector.load %arg3[%c0_3, %c0_4] : memref<16x128xf32, #tpu.memory_space<vmem>>, vector<16x128xf32>
    tpu.vector_store %arg3[%c0_3, %c0_4], %7 {strides = array<i32>} : memref<16x128xf32, #tpu.memory_space<vmem>>, vector<16x128xf32>,
    return
  }
  func.func @transform_0(%arg0: i32) -> (i32, i32) {
    %c0_i32 = arith.constant 0 : i32
    %c0_i32_0 = arith.constant 0 : i32
    return %arg0, %c0_i32 : i32, i32
  }
  func.func @transform_1(%arg0: i32) -> (i32, i32) {
    %c0_i32 = arith.constant 0 : i32
    %c0_i32_0 = arith.constant 0 : i32
    %c0_i32_1 = arith.constant 0 : i32
    return %c0_i32, %c0_i32_0 : i32, i32
  }
  func.func @transform_2(%arg0: i32) -> (i32, i32) {
    %c0_i32 = arith.constant 0 : i32
    %c0_i32_0 = arith.constant 0 : i32
    return %arg0, %c0_i32 : i32, i32
  }
}

</mosaic_0001>

<bundles_post_ra>
// kernel: tpu_custom_call.1
= control target key start
LH: loop header
LB: loop body
LE: loop exit
PB: predicated region body
PF: predicated region fallthrough
CT: control target
= control target key end

     0   :  { %7 = vsyncpa [#allocation3], 0  ;;  %s537_s0 = inlined_call_operand.vmem [shape: s32[16,1], index: 0, kind: input, shape index: {}]   ;;  %s538_s1 = inlined_call_operand.hbm [shape: f32[64,128], index: 1, kind: input, shape index: {}]   ;;  %s539_s2 = inlined_call_operand.hbm [shape: f32[16,128], index: 2, kind: output, shape index: {}]  }
   0x1   :  { %8 = vsyncpa [#allocation4], 0  ;;  %s15_s11 = sshll.u32 %s538_s1, 4  ;;  %s431_s12 = smov [#allocation2]   ;;  %s16_s11 = int_to_ptr.hbm [resolvable:$true] %s15_s11 }
   0x2   :  { %s17_s13 = sshll.u32 %s431_s12, 4  ;;  %s432_s14 = smov 128   ;;  %s18_s13 = int_to_ptr.vmem [resolvable:$true] %s17_s13 }
   0x3   :  { %s433_s15 = smov 8  }
   0x4   :  { %23 = dma.hbm_to_vmem [thread:$0]  %s16_s11, 1024, %s18_s13, [#allocation3], %s432_s14, %s432_s14, %s433_s15  }
   0x5   :  { %427 = dma.done.wait [#allocation3], 1024  }
   0x6   :  { %428 = vsyncadd [#allocation3], 4294966272  ;;  %v434_v0 = vmov 0   ;;  %v28_v1 = vld [vmem:[%s537_s0] sm:$0xff]  ;;  %v51_v2 = vld [vmem:[#allocation2 + $0x38] sm:$0xff]  ;;  %v30_v51 = vlaneseq  ;;  %vm52_vm0 = vcmask 523264  }
   0x7   :  { %378 = vset.pattern.permute.xlu0 %v434_v0  ;;  %v461_v3 = vand.u32 4294901760, %v51_v2  ;;  %v50_v4 = vld [vmem:[#allocation2 + $0x30] sm:$0xff]  ;;  %v49_v5 = vld [vmem:[#allocation2 + $0x28] sm:$0xff]  ;;  %v48_v6 = vld [vmem:[#allocation2 + $0x20] sm:$0xff]  ;;  %v435_v54 = vmov 0.0   ;;  %s335_s22 = sshll.u32 %s539_s2, 4  ;;  %s336_s22 = int_to_ptr.hbm [resolvable:$true] %s335_s22 }
   0x8   :  { %33 = vperm.xlu0 %378, %v28_v1   ;;  %v463_v7 = vand.u32 4294901760, %v50_v4  ;;  %v465_v8 = vand.u32 4294901760, %v49_v5  ;;  %v467_v9 = vand.u32 4294901760, %v48_v6  ;;  %v47_v10 = vld [vmem:[#allocation2 + $0x18] sm:$0xff]  ;;  %v46_v11 = vld [vmem:[#allocation2 + $0x10] sm:$0xff]  ;;  %v45_v12 = vld [vmem:[#allocation2 + $0x8] sm:$0xff] }
   0x9   :  { %v109_v13 = vsub.f32 %v51_v2, %v461_v3  ;;  %217 = vmatpush.msra.mxu3 %v461_v3  ;;  %v471_v14 = vand.u32 4294901760, %v47_v10  ;;  %68 = vmatpush.msra.mxu0 %v461_v3  ;;  %v474_v15 = vand.u32 4294901760, %v46_v11  ;;  %v476_v16 = vand.u32 4294901760, %v45_v12  ;;  %v29_v23 = vld [vmem:[%s537_s0 + $0x8] sm:$0xff]  ;;  %v44_v45 = vld [vmem:[#allocation2] sm:$0xff]  ;;  %s436_s0 = smov [#allocation5]  }
   0xa   :  { %v115_v17 = vsub.f32 %v50_v4, %v463_v7  ;;  %v121_v18 = vsub.f32 %v49_v5, %v465_v8  ;;  %v127_v19 = vsub.f32 %v48_v6, %v467_v9  ;;  %v81_v46 = vand.u32 4294901760, %v44_v45  ;;  %s333_s19 = sshll.u32 %s436_s0, 4  ;;  %s334_s19 = int_to_ptr.vmem [resolvable:$true] %s333_s19 }
   0xb   :  { %v110_v20 = vand.u32 4294901760, %v109_v13  ;;  %175 = vmatpush.msra.mxu2 %v109_v13  ;;  %219 = vmatpush.msra.mxu3 %v463_v7  ;;  %v133_v21 = vsub.f32 %v47_v10, %v471_v14  ;;  %v139_v22 = vsub.f32 %v46_v11, %v474_v15  ;;  %v145_v29 = vsub.f32 %v45_v12, %v476_v16 }
   0xc   :  { %v116_v24 = vand.u32 4294901760, %v115_v17  ;;  %v122_v25 = vand.u32 4294901760, %v121_v18  ;;  %v487_v26 = vand.u32 4294901760, %v127_v19  ;;  %70 = vmatpush.msra.mxu0 %v463_v7  ;;  %v151_v47 = vsub.f32 %v44_v45, %v81_v46 }
   0xd   :  { %v111_v27 = vsub.f32 %v109_v13, %v110_v20  ;;  %178 = vmatpush.msra.mxu2 %v115_v17  ;;  %v490_v28 = vand.u32 4294901760, %v133_v21  ;;  %221 = vmatpush.msra.mxu3 %v465_v8  ;;  %v140_v34 = vand.u32 4294901760, %v139_v22  ;;  %v146_v38 = vand.u32 4294901760, %v145_v29 }
   0xe   :  { %v117_v30 = vsub.f32 %v115_v17, %v116_v24  ;;  %v123_v31 = vsub.f32 %v121_v18, %v122_v25  ;;  %72 = vmatpush.msra.mxu0 %v465_v8  ;;  %v129_v33 = vsub.f32 %v127_v19, %v487_v26  ;;  %v152_v48 = vand.u32 4294901760, %v151_v47 }
   0xf   :  { %v112_v32 = vand.u32 4294901760, %v111_v27  ;;  %181 = vmatpush.msra.mxu2 %v121_v18  ;;  %223 = vmatpush.msra.mxu3 %v467_v9  ;;  %v135_v37 = vsub.f32 %v133_v21, %v490_v28  ;;  %v141_v40 = vsub.f32 %v139_v22, %v140_v34  ;;  %v147_v42 = vsub.f32 %v145_v29, %v146_v38 }
  0x10   :  { %36 = vperm.xlu0 %378, %v29_v23   ;;  %v118_v35 = vand.u32 4294901760, %v117_v30  ;;  %74 = vmatpush.msra.mxu0 %v467_v9  ;;  %v124_v36 = vand.u32 4294901760, %v123_v31  ;;  %v130_v39 = vand.u32 4294901760, %v129_v33  ;;  %v153_v49 = vsub.f32 %v151_v47, %v152_v48 }
  0x11   :  { %113 = vmatpush.msra.mxu1 %v112_v32  ;;  %184 = vmatpush.msra.mxu2 %v127_v19  ;;  %v136_v41 = vand.u32 4294901760, %v135_v37  ;;  %v142_v43 = vand.u32 4294901760, %v141_v40  ;;  %v148_v44 = vand.u32 4294901760, %v147_v42  ;;  %v31_v52 = vand.u32 127, %v30_v51 }
  0x12   :  { %225 = vmatpush.msra.mxu3 %v471_v14  ;;  %76 = vmatpush.msra.mxu0 %v471_v14  ;;  %v154_v50 = vand.u32 4294901760, %v153_v49 }
  0x13   :  { %119 = vmatpush.msra.mxu1 %v118_v35  ;;  %187 = vmatpush.msra.mxu2 %v133_v21 }
  0x14   :  { %227 = vmatpush.msra.mxu3 %v474_v15  ;;  %78 = vmatpush.msra.mxu0 %v474_v15 }
  0x15   :  { %125 = vmatpush.msra.mxu1 %v124_v36  ;;  %190 = vmatpush.msra.mxu2 %v139_v22 }
  0x16   :  { %229 = vmatpush.msra.mxu3 %v476_v16  ;;  %80 = vmatpush.msra.mxu0 %v476_v16 }
  0x17   :  { %131 = vmatpush.msra.mxu1 %v130_v39  ;;  %193 = vmatpush.msra.mxu2 %v145_v29 }
  0x18   :  { %231 = vmatpush.msra.mxu3 %v81_v46  ;;  %82 = vmatpush.msra.mxu0 %v81_v46 }
  0x19   :  { %137 = vmatpush.msra.mxu1 %v136_v41  ;;  %196 = vmatpush.msra.mxu2 %v151_v47 }
  0x1a   :  { %364 = vmatpush.msrb.mxu3 %v461_v3  ;;  %256 = vmatpush.msrb.mxu0 %v110_v20 }
  0x1b   :  { %143 = vmatpush.msra.mxu1 %v142_v43  ;;  %356 = vmatpush.msrb.mxu2 %v110_v20 }
  0x1c   :  { %365 = vmatpush.msrb.mxu3 %v463_v7  ;;  %260 = vmatpush.msrb.mxu0 %v116_v24 }
  0x1d   :  { %149 = vmatpush.msra.mxu1 %v148_v44  ;;  %357 = vmatpush.msrb.mxu2 %v116_v24 }
  0x1e   :  { %366 = vmatpush.msrb.mxu3 %v465_v8  ;;  %264 = vmatpush.msrb.mxu0 %v122_v25 }
  0x1f   :  { %358 = vmatpush.msrb.mxu2 %v122_v25  ;;  %155 = vmatpush.msra.mxu1 %v154_v50 }
  0x20   :  { %367 = vmatpush.msrb.mxu3 %v467_v9  ;;  %268 = vmatpush.msrb.mxu0 %v487_v26 }
  0x21   :  { %303 = vmatpush.msrb.mxu1 %v461_v3  ;;  %359 = vmatpush.msrb.mxu2 %v487_v26 }
  0x22   :  { %368 = vmatpush.msrb.mxu3 %v471_v14  ;;  %272 = vmatpush.msrb.mxu0 %v490_v28 }
  0x23   :  { %305 = vmatpush.msrb.mxu1 %v463_v7  ;;  %360 = vmatpush.msrb.mxu2 %v490_v28 }
  0x24   :  { %369 = vmatpush.msrb.mxu3 %v474_v15  ;;  %276 = vmatpush.msrb.mxu0 %v140_v34 }
  0x25   :  { %307 = vmatpush.msrb.mxu1 %v465_v8  ;;  %361 = vmatpush.msrb.mxu2 %v140_v34 }
  0x26   :  { %370 = vmatpush.msrb.mxu3 %v476_v16  ;;  %280 = vmatpush.msrb.mxu0 %v146_v38 }
  0x27   :  { %309 = vmatpush.msrb.mxu1 %v467_v9  ;;  %362 = vmatpush.msrb.mxu2 %v146_v38 }
  0x28   :  { %371 = vmatpush.msrb.mxu3 %v81_v46  ;;  %284 = vmatpush.msrb.mxu0 %v152_v48 }
  0x29   :  { %311 = vmatpush.msrb.mxu1 %v471_v14  ;;  %363 = vmatpush.msrb.mxu2 %v152_v48 }
  0x2b   :  { %313 = vmatpush.msrb.mxu1 %v474_v15 }
  0x2d   :  { %315 = vmatpush.msrb.mxu1 %v476_v16 }
  0x2f   :  { %317 = vmatpush.msrb.mxu1 %v81_v46 }
  0x7a   :  { %v34_v53 = vpop.permute.xlu0 %33 }
  0x7b   :  { %vm38_vm1 = vcmp.eq.s32.totalorder %v31_v52, %v34_v53 }
  0x7c   :  { %v348_v55 = vsel %vm38_vm1, 1.0, %v435_v54 }
  0x7d   :  { %350 = vmatmul.msk.f32.vlgmr.msra.gmra.mxu1 %vm52_vm0, %v348_v55  ;;  %v54_v56 = vsel %vm52_vm0, %v348_v55, 0 }
  0x7e   :  { %v84_v57 = vsub.f32 %v54_v56, %v54_v56 }
  0x80   :  { %199 = vmatmul.f32.vlgmr.msra.gmra.mxu2 %v84_v57  ;;  %v85_v58 = vand.u32 4294901760, %v84_v57 }
  0x82   :  { %235 = vmatmul.f32.vlgmr.msra.gmra.mxu3 %v85_v58  ;;  %v37_v59 = vpop.permute.xlu0 %36  ;;  %v86_v60 = vsub.f32 %v84_v57, %v85_v58 }
  0x83   :  { %vm39_vm2 = vcmp.eq.s32.totalorder %v31_v52, %v37_v59 }
  0x84   :  { %v349_v61 = vsel %vm39_vm2, 1.0, %v435_v54  ;;  %v87_v62 = vand.u32 4294901760, %v86_v60 }
  0x85   :  { %351 = vmatmul.msk.f32.gmra.mxu1 %vm52_vm0, %v349_v61  ;;  %v57_v63 = vsel %vm52_vm0, %v349_v61, 0 }
  0x86   :  { %88 = vmatmul.f32.vlgmr.msra.gmra.mxu0 %v87_v62  ;;  %v92_v0 = vsub.f32 %v57_v63, %v57_v63 }
  0x88   :  { %204 = vmatmul.f32.gmra.mxu2 %v92_v0  ;;  %v93_v1 = vand.u32 4294901760, %v92_v0 }
  0x8a   :  { %241 = vmatmul.f32.gmra.mxu3 %v93_v1  ;;  %v94_v2 = vsub.f32 %v92_v0, %v93_v1 }
  0x8c   :  { %v95_v3 = vand.u32 4294901760, %v94_v2 }
  0x8d   :  { %354 = vmatmul.msk.f32.vlgmr.msrb.gmra.mxu1 %vm52_vm0, %v348_v55 }
  0x8e   :  { %96 = vmatmul.f32.gmra.mxu0 %v95_v3 }
  0x90   :  { %353 = vmatmul.msk.f32.vlgmr.msrb.gmra.mxu2 %vm52_vm0, %v349_v61 }
  0x92   :  { %355 = vmatmul.msk.f32.vlgmr.msrb.gmra.mxu3 %vm52_vm0, %v349_v61 }
  0x96   :  { %352 = vmatmul.msk.f32.vlgmr.msrb.gmra.mxu0 %vm52_vm0, %v348_v55 }
  0xfa   :  { %v158_v4 = vpop.f32.mrf.mxu1 }
 0x102   :  { %v162_v8 = vpop.f32.mrf.mxu1 }
 0x103   :  { %v89_v5 = vpop.f32.mrf.mxu0  ;;  %v200_v6 = vpop.f32.mrf.mxu2 }
 0x104   :  { %v159_v9 = vadd.f32 %v158_v4, %v89_v5 }
 0x105   :  { %v236_v7 = vpop.f32.mrf.mxu3 }
 0x106   :  { %v201_v14 = vadd.f32 %v200_v6, %v159_v9 }
 0x108   :  { %v237_v16 = vadd.f32 %v236_v7, %v201_v14 }
 0x10a   :  { %v320_v22 = vpop.f32.mrf.mxu1 }
 0x10b   :  { %v97_v10 = vpop.f32.mrf.mxu0  ;;  %v205_v11 = vpop.f32.mrf.mxu2 }
 0x10c   :  { %v163_v12 = vadd.f32 %v162_v8, %v97_v10 }
 0x10d   :  { %v242_v13 = vpop.f32.mrf.mxu3 }
 0x10e   :  { %v206_v15 = vadd.f32 %v205_v11, %v163_v12 }
 0x110   :  { %v243_v17 = vadd.f32 %v242_v13, %v206_v15 }
 0x113   :  { %v287_v18 = vpop.f32.mrf.mxu0  ;;  %v291_v19 = vpop.f32.mrf.mxu2 }
 0x114   :  { %v288_v20 = vadd.f32 %v287_v18, %v237_v16  ;;  %v292_v21 = vadd.f32 %v291_v19, %v243_v17 }
 0x115   :  { %v324_v23 = vpop.f32.mrf.mxu3 }
 0x116   :  { %v321_v24 = vadd.f32 %v320_v22, %v288_v20  ;;  %v325_v25 = vadd.f32 %v324_v23, %v292_v21 }
 0x118   :  { %327 = vst [vmem:[#allocation5] sm:$0xff] %v321_v24 }
 0x119   :  { %328 = vst [vmem:[#allocation5 + $0x8] sm:$0xff] %v325_v25 }
 0x11a   :  { %341 = dma.vmem_to_hbm [thread:$0]  %s334_s19, 256, %s336_s22, [#allocation4], %s432_s14, %s432_s14, %s433_s15  }
 0x11b   :  { %429 = dma.done.wait [#allocation4], 256  }
 0x11c   :  { %430 = vsyncadd [#allocation4], 4294967040 }
 0x11d   :  { %346 = vsyncpa [#allocation3], 1 }
 0x11e   :  { %347 = vsyncpa [#allocation4], 1 }

// kernel: tpu_custom_call.1
= control target key start
LH: loop header
LB: loop body
LE: loop exit
PB: predicated region body
PF: predicated region fallthrough
CT: control target
= control target key end

     0   :  { %7 = vsyncpa [#allocation3], 0  ;;  %s537_s0 = inlined_call_operand.vmem [shape: s32[16,1], index: 0, kind: input, shape index: {}]   ;;  %s538_s1 = inlined_call_operand.hbm [shape: f32[64,128], index: 1, kind: input, shape index: {}]   ;;  %s539_s2 = inlined_call_operand.hbm [shape: f32[16,128], index: 2, kind: output, shape index: {}]  }
   0x1   :  { %8 = vsyncpa [#allocation4], 0  ;;  %s15_s11 = sshll.u32 %s538_s1, 4  ;;  %s431_s12 = smov [#allocation2]   ;;  %s16_s11 = int_to_ptr.hbm [resolvable:$true] %s15_s11 }
   0x2   :  { %s17_s13 = sshll.u32 %s431_s12, 4  ;;  %s432_s14 = smov 128   ;;  %s18_s13 = int_to_ptr.vmem [resolvable:$true] %s17_s13 }
   0x3   :  { %s433_s15 = smov 8  }
   0x4   :  { %23 = dma.hbm_to_vmem [thread:$0]  %s16_s11, 1024, %s18_s13, [#allocation3], %s432_s14, %s432_s14, %s433_s15  }
   0x5   :  { %427 = dma.done.wait [#allocation3], 1024  }
   0x6   :  { %428 = vsyncadd [#allocation3], 4294966272  ;;  %v434_v0 = vmov 0   ;;  %v28_v1 = vld [vmem:[%s537_s0] sm:$0xff]  ;;  %v51_v2 = vld [vmem:[#allocation2 + $0x38] sm:$0xff]  ;;  %v30_v51 = vlaneseq  ;;  %vm52_vm0 = vcmask 523264  }
   0x7   :  { %378 = vset.pattern.permute.xlu0 %v434_v0  ;;  %v461_v3 = vand.u32 4294901760, %v51_v2  ;;  %v50_v4 = vld [vmem:[#allocation2 + $0x30] sm:$0xff]  ;;  %v49_v5 = vld [vmem:[#allocation2 + $0x28] sm:$0xff]  ;;  %v48_v6 = vld [vmem:[#allocation2 + $0x20] sm:$0xff]  ;;  %v435_v54 = vmov 0.0   ;;  %s335_s22 = sshll.u32 %s539_s2, 4  ;;  %s336_s22 = int_to_ptr.hbm [resolvable:$true] %s335_s22 }
   0x8   :  { %33 = vperm.xlu0 %378, %v28_v1   ;;  %v463_v7 = vand.u32 4294901760, %v50_v4  ;;  %v465_v8 = vand.u32 4294901760, %v49_v5  ;;  %v467_v9 = vand.u32 4294901760, %v48_v6  ;;  %v47_v10 = vld [vmem:[#allocation2 + $0x18] sm:$0xff]  ;;  %v46_v11 = vld [vmem:[#allocation2 + $0x10] sm:$0xff]  ;;  %v45_v12 = vld [vmem:[#allocation2 + $0x8] sm:$0xff] }
   0x9   :  { %v109_v13 = vsub.f32 %v51_v2, %v461_v3  ;;  %217 = vmatpush.msra.mxu3 %v461_v3  ;;  %v471_v14 = vand.u32 4294901760, %v47_v10  ;;  %68 = vmatpush.msra.mxu0 %v461_v3  ;;  %v474_v15 = vand.u32 4294901760, %v46_v11  ;;  %v476_v16 = vand.u32 4294901760, %v45_v12  ;;  %v29_v23 = vld [vmem:[%s537_s0 + $0x8] sm:$0xff]  ;;  %v44_v45 = vld [vmem:[#allocation2] sm:$0xff]  ;;  %s436_s0 = smov [#allocation5]  }
   0xa   :  { %v115_v17 = vsub.f32 %v50_v4, %v463_v7  ;;  %v121_v18 = vsub.f32 %v49_v5, %v465_v8  ;;  %v127_v19 = vsub.f32 %v48_v6, %v467_v9  ;;  %v81_v46 = vand.u32 4294901760, %v44_v45  ;;  %s333_s19 = sshll.u32 %s436_s0, 4  ;;  %s334_s19 = int_to_ptr.vmem [resolvable:$true] %s333_s19 }
   0xb   :  { %v110_v20 = vand.u32 4294901760, %v109_v13  ;;  %175 = vmatpush.msra.mxu2 %v109_v13  ;;  %219 = vmatpush.msra.mxu3 %v463_v7  ;;  %v133_v21 = vsub.f32 %v47_v10, %v471_v14  ;;  %v139_v22 = vsub.f32 %v46_v11, %v474_v15  ;;  %v145_v29 = vsub.f32 %v45_v12, %v476_v16 }
   0xc   :  { %v116_v24 = vand.u32 4294901760, %v115_v17  ;;  %v122_v25 = vand.u32 4294901760, %v121_v18  ;;  %v487_v26 = vand.u32 4294901760, %v127_v19  ;;  %70 = vmatpush.msra.mxu0 %v463_v7  ;;  %v151_v47 = vsub.f32 %v44_v45, %v81_v46 }
   0xd   :  { %v111_v27 = vsub.f32 %v109_v13, %v110_v20  ;;  %178 = vmatpush.msra.mxu2 %v115_v17  ;;  %v490_v28 = vand.u32 4294901760, %v133_v21  ;;  %221 = vmatpush.msra.mxu3 %v465_v8  ;;  %v140_v34 = vand.u32 4294901760, %v139_v22  ;;  %v146_v38 = vand.u32 4294901760, %v145_v29 }
   0xe   :  { %v117_v30 = vsub.f32 %v115_v17, %v116_v24  ;;  %v123_v31 = vsub.f32 %v121_v18, %v122_v25  ;;  %72 = vmatpush.msra.mxu0 %v465_v8  ;;  %v129_v33 = vsub.f32 %v127_v19, %v487_v26  ;;  %v152_v48 = vand.u32 4294901760, %v151_v47 }
   0xf   :  { %v112_v32 = vand.u32 4294901760, %v111_v27  ;;  %181 = vmatpush.msra.mxu2 %v121_v18  ;;  %223 = vmatpush.msra.mxu3 %v467_v9  ;;  %v135_v37 = vsub.f32 %v133_v21, %v490_v28  ;;  %v141_v40 = vsub.f32 %v139_v22, %v140_v34  ;;  %v147_v42 = vsub.f32 %v145_v29, %v146_v38 }
  0x10   :  { %36 = vperm.xlu0 %378, %v29_v23   ;;  %v118_v35 = vand.u32 4294901760, %v117_v30  ;;  %74 = vmatpush.msra.mxu0 %v467_v9  ;;  %v124_v36 = vand.u32 4294901760, %v123_v31  ;;  %v130_v39 = vand.u32 4294901760, %v129_v33  ;;  %v153_v49 = vsub.f32 %v151_v47, %v152_v48 }
  0x11   :  { %113 = vmatpush.msra.mxu1 %v112_v32  ;;  %184 = vmatpush.msra.mxu2 %v127_v19  ;;  %v136_v41 = vand.u32 4294901760, %v135_v37  ;;  %v142_v43 = vand.u32 4294901760, %v141_v40  ;;  %v148_v44 = vand.u32 4294901760, %v147_v42  ;;  %v31_v52 = vand.u32 127, %v30_v51 }
  0x12   :  { %225 = vmatpush.msra.mxu3 %v471_v14  ;;  %76 = vmatpush.msra.mxu0 %v471_v14  ;;  %v154_v50 = vand.u32 4294901760, %v153_v49 }
  0x13   :  { %119 = vmatpush.msra.mxu1 %v118_v35  ;;  %187 = vmatpush.msra.mxu2 %v133_v21 }
  0x14   :  { %227 = vmatpush.msra.mxu3 %v474_v15  ;;  %78 = vmatpush.msra.mxu0 %v474_v15 }
  0x15   :  { %125 = vmatpush.msra.mxu1 %v124_v36  ;;  %190 = vmatpush.msra.mxu2 %v139_v22 }
  0x16   :  { %229 = vmatpush.msra.mxu3 %v476_v16  ;;  %80 = vmatpush.msra.mxu0 %v476_v16 }
  0x17   :  { %131 = vmatpush.msra.mxu1 %v130_v39  ;;  %193 = vmatpush.msra.mxu2 %v145_v29 }
  0x18   :  { %231 = vmatpush.msra.mxu3 %v81_v46  ;;  %82 = vmatpush.msra.mxu0 %v81_v46 }
  0x19   :  { %137 = vmatpush.msra.mxu1 %v136_v41  ;;  %196 = vmatpush.msra.mxu2 %v151_v47 }
  0x1a   :  { %364 = vmatpush.msrb.mxu3 %v461_v3  ;;  %256 = vmatpush.msrb.mxu0 %v110_v20 }
  0x1b   :  { %143 = vmatpush.msra.mxu1 %v142_v43  ;;  %356 = vmatpush.msrb.mxu2 %v110_v20 }
  0x1c   :  { %365 = vmatpush.msrb.mxu3 %v463_v7  ;;  %260 = vmatpush.msrb.mxu0 %v116_v24 }
  0x1d   :  { %149 = vmatpush.msra.mxu1 %v148_v44  ;;  %357 = vmatpush.msrb.mxu2 %v116_v24 }
  0x1e   :  { %366 = vmatpush.msrb.mxu3 %v465_v8  ;;  %264 = vmatpush.msrb.mxu0 %v122_v25 }
  0x1f   :  { %358 = vmatpush.msrb.mxu2 %v122_v25  ;;  %155 = vmatpush.msra.mxu1 %v154_v50 }
  0x20   :  { %367 = vmatpush.msrb.mxu3 %v467_v9  ;;  %268 = vmatpush.msrb.mxu0 %v487_v26 }
  0x21   :  { %303 = vmatpush.msrb.mxu1 %v461_v3  ;;  %359 = vmatpush.msrb.mxu2 %v487_v26 }
  0x22   :  { %368 = vmatpush.msrb.mxu3 %v471_v14  ;;  %272 = vmatpush.msrb.mxu0 %v490_v28 }
  0x23   :  { %305 = vmatpush.msrb.mxu1 %v463_v7  ;;  %360 = vmatpush.msrb.mxu2 %v490_v28 }
  0x24   :  { %369 = vmatpush.msrb.mxu3 %v474_v15  ;;  %276 = vmatpush.msrb.mxu0 %v140_v34 }
  0x25   :  { %307 = vmatpush.msrb.mxu1 %v465_v8  ;;  %361 = vmatpush.msrb.mxu2 %v140_v34 }
  0x26   :  { %370 = vmatpush.msrb.mxu3 %v476_v16  ;;  %280 = vmatpush.msrb.mxu0 %v146_v38 }
  0x27   :  { %309 = vmatpush.msrb.mxu1 %v467_v9  ;;  %362 = vmatpush.msrb.mxu2 %v146_v38 }
  0x28   :  { %371 = vmatpush.msrb.mxu3 %v81_v46  ;;  %284 = vmatpush.msrb.mxu0 %v152_v48 }
  0x29   :  { %311 = vmatpush.msrb.mxu1 %v471_v14  ;;  %363 = vmatpush.msrb.mxu2 %v152_v48 }
  0x2b   :  { %313 = vmatpush.msrb.mxu1 %v474_v15 }
  0x2d   :  { %315 = vmatpush.msrb.mxu1 %v476_v16 }
  0x2f   :  { %317 = vmatpush.msrb.mxu1 %v81_v46 }
  0x7a   :  { %v34_v53 = vpop.permute.xlu0 %33 }
  0x7b   :  { %vm38_vm1 = vcmp.eq.s32.totalorder %v31_v52, %v34_v53 }
  0x7c   :  { %v348_v55 = vsel %vm38_vm1, 1.0, %v435_v54 }
  0x7d   :  { %350 = vmatmul.msk.f32.vlgmr.msra.gmra.mxu1 %vm52_vm0, %v348_v55  ;;  %v54_v56 = vsel %vm52_vm0, %v348_v55, 0 }
  0x7e   :  { %v84_v57 = vsub.f32 %v54_v56, %v54_v56 }
  0x80   :  { %199 = vmatmul.f32.vlgmr.msra.gmra.mxu2 %v84_v57  ;;  %v85_v58 = vand.u32 4294901760, %v84_v57 }
  0x82   :  { %235 = vmatmul.f32.vlgmr.msra.gmra.mxu3 %v85_v58  ;;  %v37_v59 = vpop.permute.xlu0 %36  ;;  %v86_v60 = vsub.f32 %v84_v57, %v85_v58 }
  0x83   :  { %vm39_vm2 = vcmp.eq.s32.totalorder %v31_v52, %v37_v59 }
  0x84   :  { %v349_v61 = vsel %vm39_vm2, 1.0, %v435_v54  ;;  %v87_v62 = vand.u32 4294901760, %v86_v60 }
  0x85   :  { %351 = vmatmul.msk.f32.gmra.mxu1 %vm52_vm0, %v349_v61  ;;  %v57_v63 = vsel %vm52_vm0, %v349_v61, 0 }
  0x86   :  { %88 = vmatmul.f32.vlgmr.msra.gmra.mxu0 %v87_v62  ;;  %v92_v0 = vsub.f32 %v57_v63, %v57_v63 }
  0x88   :  { %204 = vmatmul.f32.gmra.mxu2 %v92_v0  ;;  %v93_v1 = vand.u32 4294901760, %v92_v0 }
  0x8a   :  { %241 = vmatmul.f32.gmra.mxu3 %v93_v1  ;;  %v94_v2 = vsub.f32 %v92_v0, %v93_v1 }
  0x8c   :  { %v95_v3 = vand.u32 4294901760, %v94_v2 }
  0x8d   :  { %354 = vmatmul.msk.f32.vlgmr.msrb.gmra.mxu1 %vm52_vm0, %v348_v55 }
  0x8e   :  { %96 = vmatmul.f32.gmra.mxu0 %v95_v3 }
  0x90   :  { %353 = vmatmul.msk.f32.vlgmr.msrb.gmra.mxu2 %vm52_vm0, %v349_v61 }
  0x92   :  { %355 = vmatmul.msk.f32.vlgmr.msrb.gmra.mxu3 %vm52_vm0, %v349_v61 }
  0x96   :  { %352 = vmatmul.msk.f32.vlgmr.msrb.gmra.mxu0 %vm52_vm0, %v348_v55 }
  0xfa   :  { %v158_v4 = vpop.f32.mrf.mxu1 }
 0x102   :  { %v162_v8 = vpop.f32.mrf.mxu1 }
 0x103   :  { %v89_v5 = vpop.f32.mrf.mxu0  ;;  %v200_v6 = vpop.f32.mrf.mxu2 }
 0x104   :  { %v159_v9 = vadd.f32 %v158_v4, %v89_v5 }
 0x105   :  { %v236_v7 = vpop.f32.mrf.mxu3 }
 0x106   :  { %v201_v14 = vadd.f32 %v200_v6, %v159_v9 }
 0x108   :  { %v237_v16 = vadd.f32 %v236_v7, %v201_v14 }
 0x10a   :  { %v320_v22 = vpop.f32.mrf.mxu1 }
 0x10b   :  { %v97_v10 = vpop.f32.mrf.mxu0  ;;  %v205_v11 = vpop.f32.mrf.mxu2 }
 0x10c   :  { %v163_v12 = vadd.f32 %v162_v8, %v97_v10 }
 0x10d   :  { %v242_v13 = vpop.f32.mrf.mxu3 }
 0x10e   :  { %v206_v15 = vadd.f32 %v205_v11, %v163_v12 }
 0x110   :  { %v243_v17 = vadd.f32 %v242_v13, %v206_v15 }
 0x113   :  { %v287_v18 = vpop.f32.mrf.mxu0  ;;  %v291_v19 = vpop.f32.mrf.mxu2 }
 0x114   :  { %v288_v20 = vadd.f32 %v287_v18, %v237_v16  ;;  %v292_v21 = vadd.f32 %v291_v19, %v243_v17 }
 0x115   :  { %v324_v23 = vpop.f32.mrf.mxu3 }
 0x116   :  { %v321_v24 = vadd.f32 %v320_v22, %v288_v20  ;;  %v325_v25 = vadd.f32 %v324_v23, %v292_v21 }
 0x118   :  { %327 = vst [vmem:[#allocation5] sm:$0xff] %v321_v24 }
 0x119   :  { %328 = vst [vmem:[#allocation5 + $0x8] sm:$0xff] %v325_v25 }
 0x11a   :  { %341 = dma.vmem_to_hbm [thread:$0]  %s334_s19, 256, %s336_s22, [#allocation4], %s432_s14, %s432_s14, %s433_s15  }
 0x11b   :  { %429 = dma.done.wait [#allocation4], 256  }
 0x11c   :  { %430 = vsyncadd [#allocation4], 4294967040 }
 0x11d   :  { %346 = vsyncpa [#allocation3], 1 }
 0x11e   :  { %347 = vsyncpa [#allocation4], 1 }

</bundles_post_ra>
